<compile_context>
chip_gen: v7x
topology: tpu7x:2x2x1
jax: 0.10.0
libtpu: 0.0.40
codegen_flags: <defaults>
</compile_context>

<pallas_src>
import functools

import jax
import jax.numpy as jnp
from jax.experimental import pallas as pl
from jax.experimental.pallas import tpu as pltpu


def _round_up(x, m):
    return (x + m - 1) // m * m


def _triplet_kernel(a_ref, p_ref, n_ref, out_ref, *, margin, batch, tile_rows):
    i = pl.program_id(0)

    # Upcast (inputs may be bf16 to halve HBM traffic); accumulate in f32.
    a = a_ref[...].astype(jnp.float32)
    p = p_ref[...].astype(jnp.float32)
    n = n_ref[...].astype(jnp.float32)

    dp = a - p
    dn = a - n

    # L2 norm over the feature axis (dim=1). Cross-lane reduce -> XLU,
    # sqrt -> EUP: both run on free slots next to the VPU sub/mul.
    pos_dist = jnp.sqrt(jnp.sum(dp * dp, axis=1, keepdims=True))   # (TB, 1)
    neg_dist = jnp.sqrt(jnp.sum(dn * dn, axis=1, keepdims=True))   # (TB, 1)

    hinge = jnp.maximum(pos_dist - neg_dist + jnp.float32(margin), 0.0)

    # Mask rows past the true batch size (last tile may be partial).
    row = jax.lax.broadcasted_iota(jnp.int32, hinge.shape, 0)
    valid = batch - i * tile_rows
    out_ref[...] = jnp.where(row < valid, hinge, 0.0)


def triplet_loss(anchor, positive, negative, margin=1.0, tile_rows=None):
    """TripletLoss forward. anchor/positive/negative: (B, D). Returns f32 scalar."""
    assert anchor.shape == positive.shape == negative.shape
    assert anchor.ndim == 2
    B, D = anchor.shape
    itemsize = jnp.dtype(anchor.dtype).itemsize

    if tile_rows is None:
        # ~2 MiB per input tile: 3 inputs x 2 buffers x 2 MiB = 12 MiB, safely
        # inside v5e's 16 MiB scoped default and far under v7x's 64 MiB VMEM.
        target_bytes = 2 * 1024 * 1024
        tb = max(8, (target_bytes // max(1, D * itemsize)) // 8 * 8)
        tile_rows = int(min(tb, _round_up(B, 8)))
    assert tile_rows % 8 == 0

    num_tiles = pl.cdiv(B, tile_rows)

    kernel = functools.partial(
        _triplet_kernel, margin=float(margin), batch=B, tile_rows=tile_rows)

    in_spec = pl.BlockSpec((tile_rows, D), lambda i: (i, 0))
    out_spec = pl.BlockSpec((tile_rows, 1), lambda i: (i, 0))

    # 3 inputs x 2 pipeline buffers + 2 output buffers, plus slack.
    vmem_need = 3 * 2 * tile_rows * D * itemsize + 2 * tile_rows * 4
    vmem_limit = int(min(64 * 1024 * 1024,
                         max(16 * 1024 * 1024, 2 * vmem_need + (2 << 20))))

    hinge_rows = pl.pallas_call(
        kernel,
        out_shape=jax.ShapeDtypeStruct((num_tiles * tile_rows, 1), jnp.float32),
        grid=(num_tiles,),
        in_specs=[in_spec, in_spec, in_spec],
        out_specs=out_spec,
        compiler_params=pltpu.CompilerParams(
            dimension_semantics=("parallel",),
            vmem_limit_bytes=vmem_limit,
        ),
        cost_estimate=pl.CostEstimate(
            flops=8 * B * D,
            transcendentals=2 * B,
            bytes_accessed=3 * B * D * itemsize + 4 * B,
        ),
    )(anchor, positive, negative)

    # Tiny final reduction (num_tiles * tile_rows values) + true-batch mean.
    return jnp.sum(hinge_rows) / jnp.float32(B)


def triplet_loss_ref(anchor, positive, negative, margin=1.0):
    pos = jnp.linalg.norm((anchor - positive).astype(jnp.float32), axis=1)
    neg = jnp.linalg.norm((anchor - negative).astype(jnp.float32), axis=1)
    return jnp.mean(jnp.maximum(pos - neg + margin, 0.0))


if __name__ == "__main__":
    key = jax.random.PRNGKey(0)
    k1, k2, k3, k4, k5, k6 = jax.random.split(key, 6)

    # Small shapes consistent with the module: (batch, embedding_dim).
    B, D = 8, 128
    anchor = jax.random.normal(k1, (B, D), dtype=jnp.float32)
    positive = jax.random.normal(k2, (B, D), dtype=jnp.float32)
    negative = jax.random.normal(k3, (B, D), dtype=jnp.float32)

    loss = jax.block_until_ready(
        triplet_loss(anchor, positive, negative, margin=1.0))
    ref = triplet_loss_ref(anchor, positive, negative, margin=1.0)
    assert jnp.allclose(loss, ref, atol=1e-5, rtol=1e-5), (loss, ref)

    # Multi-tile + partial-last-tile path (exercises masking + parallel grid).
    B2 = 20
    a2 = jax.random.normal(k4, (B2, D), dtype=jnp.float32)
    p2 = jax.random.normal(k5, (B2, D), dtype=jnp.float32)
    n2 = jax.random.normal(k6, (B2, D), dtype=jnp.float32)
    loss2 = jax.block_until_ready(
        triplet_loss(a2, p2, n2, margin=1.0, tile_rows=8))
    ref2 = triplet_loss_ref(a2, p2, n2, margin=1.0)
    assert jnp.allclose(loss2, ref2, atol=1e-5, rtol=1e-5), (loss2, ref2)

    print("KERNEL_OK")
</pallas_src>

<mosaic_0001>
module attributes {stable_mosaic.version = 11 : i64} {
  func.func @_triplet_kernel(%arg0: i32, %arg1: memref<8x128xf32, #tpu.memory_space<vmem>>, %arg2: memref<8x128xf32, #tpu.memory_space<vmem>>, %arg3: memref<8x128xf32, #tpu.memory_space<vmem>>, %arg4: memref<8x1xf32, #tpu.memory_space<vmem>>) attributes {dimension_semantics = [#tpu.dimension_semantics<parallel>], iteration_bounds = array<i64: 1>, scalar_prefetch = 0 : i64, scratch_operands = 0 : i64, tpu.core_type = #tpu.core_type<tc>, window_params = [{transform_indices = @transform_0, window_bounds = array<i64: 8, 128>}, {transform_indices = @transform_1, window_bounds = array<i64: 8, 128>}, {transform_indices = @transform_2, window_bounds = array<i64: 8, 128>}, {transform_indices = @transform_3, window_bounds = array<i64: 8, 1>}]} {
    %c0 = arith.constant 0 : index
    %c0_0 = arith.constant 0 : index
    %0 = vector.load %arg1[%c0, %c0_0] : memref<8x128xf32, #tpu.memory_space<vmem>>, vector<8x128xf32>
    %c0_1 = arith.constant 0 : index
    %c0_2 = arith.constant 0 : index
    %1 = vector.load %arg2[%c0_1, %c0_2] : memref<8x128xf32, #tpu.memory_space<vmem>>, vector<8x128xf32>
    %c0_3 = arith.constant 0 : index
    %c0_4 = arith.constant 0 : index
    %2 = vector.load %arg3[%c0_3, %c0_4] : memref<8x128xf32, #tpu.memory_space<vmem>>, vector<8x128xf32>
    %3 = arith.subf %0, %1 : vector<8x128xf32>
    %4 = arith.subf %0, %2 : vector<8x128xf32>
    %5 = arith.mulf %3, %3 : vector<8x128xf32>
    %cst = arith.constant dense<0.000000e+00> : vector<8xf32>
    %6 = vector.multi_reduction <add>, %5, %cst [1] : vector<8x128xf32> to vector<8xf32>
    %7 = vector.shape_cast %6 : vector<8xf32> to vector<8x1xf32>
    %8 = math.sqrt %7 : vector<8x1xf32>
    %9 = arith.mulf %4, %4 : vector<8x128xf32>
    %cst_5 = arith.constant dense<0.000000e+00> : vector<8xf32>
    %10 = vector.multi_reduction <add>, %9, %cst_5 [1] : vector<8x128xf32> to vector<8xf32>
    %11 = vector.shape_cast %10 : vector<8xf32> to vector<8x1xf32>
    %12 = math.sqrt %11 : vector<8x1xf32>
    %13 = arith.subf %8, %12 : vector<8x1xf32>
    %cst_6 = arith.constant 1.000000e+00 : f32
    %14 = vector.broadcast %cst_6 : f32 to vector<8x1xf32>
    %15 = arith.addf %13, %14 : vector<8x1xf32>
    %cst_7 = arith.constant 0.000000e+00 : f32
    %16 = vector.broadcast %cst_7 : f32 to vector<8x1xf32>
    %17 = arith.maximumf %15, %16 : vector<8x1xf32>
    %18 = tpu.iota {dimensions = array<i32: 0>} : vector<8x1xi32>
    %c8_i32 = arith.constant 8 : i32
    %19 = arith.muli %arg0, %c8_i32 : i32
    %c8_i32_8 = arith.constant 8 : i32
    %20 = arith.subi %c8_i32_8, %19 : i32
    %21 = vector.broadcast %20 : i32 to vector<8x1xi32>
    %22 = arith.cmpi slt, %18, %21 : vector<8x1xi32>
    %cst_9 = arith.constant 0.000000e+00 : f32
    %23 = vector.broadcast %cst_9 : f32 to vector<8x1xf32>
    %24 = arith.select %22, %17, %23 : vector<8x1xi1>, vector<8x1xf32>
    %c0_10 = arith.constant 0 : index
    %c0_11 = arith.constant 0 : index
    %25 = vector.load %arg4[%c0_10, %c0_11] : memref<8x1xf32, #tpu.memory_space<vmem>>, vector<8x1xf32>
    tpu.vector_store %arg4[%c0_10, %c0_11], %24 {strides = array<i32>} : memref<8x1xf32, #tpu.memory_space<vmem>>, vector<8x1xf32>,
    return
  }
  func.func @transform_0(%arg0: i32) -> (i32, i32) {
    %c0_i32 = arith.constant 0 : i32
    %c0_i32_0 = arith.constant 0 : i32
    return %arg0, %c0_i32 : i32, i32
  }
  func.func @transform_1(%arg0: i32) -> (i32, i32) {
    %c0_i32 = arith.constant 0 : i32
    %c0_i32_0 = arith.constant 0 : i32
    return %arg0, %c0_i32 : i32, i32
  }
  func.func @transform_2(%arg0: i32) -> (i32, i32) {
    %c0_i32 = arith.constant 0 : i32
    %c0_i32_0 = arith.constant 0 : i32
    return %arg0, %c0_i32 : i32, i32
  }
  func.func @transform_3(%arg0: i32) -> (i32, i32) {
    %c0_i32 = arith.constant 0 : i32
    %c0_i32_0 = arith.constant 0 : i32
    return %arg0, %c0_i32 : i32, i32
  }
}

</mosaic_0001>

<bundles_post_ra>
// kernel: tpu_custom_call.1
= control target key start
LH: loop header
LB: loop body
LE: loop exit
PB: predicated region body
PF: predicated region fallthrough
CT: control target
= control target key end

     0   :  { %8 = vsyncpa [#allocation3], 0  ;;  %s231_s0 = inlined_call_operand.hbm [shape: f32[8,128], index: 0, kind: input, shape index: {}]   ;;  %s232_s1 = inlined_call_operand.hbm [shape: f32[8,128], index: 1, kind: input, shape index: {}]   ;;  %s233_s2 = inlined_call_operand.hbm [shape: f32[8,128], index: 2, kind: input, shape index: {}]   ;;  %s234_s3 = inlined_call_operand.vmem [shape: f32[8,1], index: 3, kind: output, shape index: {}]  }
   0x1   :  { %9 = vsyncpa [#allocation5], 0  ;;  %s169_s12 = smov [#allocation4]   ;;  %s170_s14 = smov [#allocation2]  }
   0x2   :  { %s26_s13 = sshll.u32 %s169_s12, 4  ;;  %s16_s15 = sshll.u32 %s170_s14, 4  ;;  %s27_s13 = int_to_ptr.vmem [resolvable:$true] %s26_s13  ;;  %s17_s15 = int_to_ptr.vmem [resolvable:$true] %s16_s15 }
   0x3   :  { %s99_s18 = scalar_lea.hbm %s232_s1, 128 }
   0x4   :  { %p100_p0 = scmp.ne.s32.totalorder %s232_s1, %s99_s18  ;;  %p103_p1 = scmp.lt.u32.totalorder %s99_s18, %s232_s1 }
   0x6   :  { %p105_p2 = pnand %p103_p1, %p100_p0 }
   0x8   :  { %108 = shalt.err (!%p105_p2)
}
   0x9   :  { %s109_s23 = scalar_lea.vmem %s27_s13, 128  ;;  %p114_p4 = scmp.lt.s32.totalorder %s27_s13, %s27_s13 }
   0xa   :  { %p110_p3 = scmp.ne.s32.totalorder %s27_s13, %s109_s23  ;;  %p115_p5 = scmp.lt.s32.totalorder %s109_s23, %s109_s23 }
   0xc   :  { %p116_p6 = por %p115_p5, %p114_p4 }
   0xe   :  { %p117_p7 = pnand %p116_p6, %p110_p3 }
  0x10   :  { %120 = shalt.err (!%p117_p7)
}
  0x11   :  { %29 = dma.hbm_to_vmem [thread:$0]  %s232_s1, 128, %s27_s13, [#allocation5]  }
  0x12   :  { %s121_s28 = scalar_lea.hbm %s231_s0, 128 }
  0x13   :  { %p122_p8 = scmp.ne.s32.totalorder %s231_s0, %s121_s28  ;;  %p125_p9 = scmp.lt.u32.totalorder %s121_s28, %s231_s0 }
  0x15   :  { %p127_p10 = pnand %p125_p9, %p122_p8 }
  0x17   :  { %130 = shalt.err (!%p127_p10)
}
  0x18   :  { %s131_s6 = scalar_lea.vmem %s17_s15, 128  ;;  %p136_p12 = scmp.lt.s32.totalorder %s17_s15, %s17_s15 }
  0x19   :  { %p132_p11 = scmp.ne.s32.totalorder %s17_s15, %s131_s6  ;;  %p137_p13 = scmp.lt.s32.totalorder %s131_s6, %s131_s6 }
  0x1b   :  { %p138_p0 = por %p137_p13, %p136_p12 }
  0x1d   :  { %p139_p1 = pnand %p138_p0, %p132_p11 }
  0x1f   :  { %142 = shalt.err (!%p139_p1)
}
  0x20   :  { %19 = dma.hbm_to_vmem [thread:$0]  %s231_s0, 128, %s17_s15, [#allocation3]  }
  0x21   :  { %s171_s8 = smov [#allocation6]   ;;  %s143_s12 = scalar_lea.hbm %s233_s2, 128 }
  0x22   :  { %s36_s9 = sshll.u32 %s171_s8, 4  ;;  %p144_p2 = scmp.ne.s32.totalorder %s233_s2, %s143_s12  ;;  %s37_s9 = int_to_ptr.vmem [resolvable:$true] %s36_s9 }
  0x23   :  { %p147_p3 = scmp.lt.u32.totalorder %s143_s12, %s233_s2 }
  0x25   :  { %p149_p4 = pnand %p147_p3, %p144_p2 }
  0x27   :  { %152 = shalt.err (!%p149_p4)
}
  0x28   :  { %s153_s18 = scalar_lea.vmem %s37_s9, 128  ;;  %p158_p6 = scmp.lt.s32.totalorder %s37_s9, %s37_s9 }
  0x29   :  { %p154_p5 = scmp.ne.s32.totalorder %s37_s9, %s153_s18  ;;  %p159_p7 = scmp.lt.s32.totalorder %s153_s18, %s153_s18 }
  0x2b   :  { %p160_p8 = por %p159_p7, %p158_p6 }
  0x2d   :  { %p161_p9 = pnand %p160_p8, %p154_p5 }
  0x2f   :  { %164 = shalt.err (!%p161_p9)
}
  0x30   :  { %39 = dma.hbm_to_vmem [thread:$0]  %s233_s2, 128, %s37_s9, [#allocation5]  }
  0x31   :  { %165 = dma.done.wait [#allocation3], 128  }
  0x32   :  { %166 = vsyncadd [#allocation3], 4294967168 }
  0x33   :  { %167 = dma.done.wait [#allocation5], 256  }
  0x34   :  { %168 = vsyncadd [#allocation5], 4294967040  ;;  %v49_v0 = vld [vmem:[#allocation2] sm:$0xff]  ;;  %v50_v1 = vld [vmem:[#allocation4] sm:$0xff]  ;;  %vm84_vm4 = vcmask 7168  }
  0x35   :  { %v51_v2 = vld [vmem:[#allocation6] sm:$0xff]  ;;  %v52_v3 = vsub.f32 %v49_v0, %v50_v1 }
  0x36   :  { %v53_v4 = vsub.f32 %v49_v0, %v51_v2 }
  0x37   :  { %v54_v5 = vmul.f32 %v52_v3, %v52_v3 }
  0x38   :  { %v64_v6 = vmul.f32 %v53_v4, %v53_v4 }
  0x39   :  { %55 = vadd.xlane.f32.xlu0 %v54_v5 }
  0x3d   :  { %65 = vadd.xlane.f32.xlu0 %v64_v6 }
  0xc6   :  { %v56_v7 = vpop.xlane.xlu0 %55 }
  0xc7   :  { %95 = vrsqrt.f32 %v56_v7  ;;  %vm59_vm0 = vcmp.eq.f32.partialorder %v56_v7, inf  ;;  %v62_v14 = vand.u32 2147483648, %v56_v7  ;;  %vm61_vm2 = vcmp.eq.f32.partialorder %v56_v7, 0.0 }
  0xca   :  { %v66_v8 = vpop.xlane.xlu0 %65 }
  0xcb   :  { %97 = vrsqrt.f32 %v66_v8  ;;  %vm69_vm1 = vcmp.eq.f32.partialorder %v66_v8, inf  ;;  %v72_v15 = vand.u32 2147483648, %v66_v8  ;;  %vm71_vm3 = vcmp.eq.f32.partialorder %v66_v8, 0.0 }
  0xd1   :  { %v96_v9 = vpop.eup %95 }
  0xd2   :  { %v58_v10 = vmul.f32 %v96_v9, %v56_v7 }
  0xd4   :  { %v60_v12 = vsel %vm59_vm0, %v56_v7, %v58_v10 }
  0xd5   :  { %v98_v11 = vpop.eup %97  ;;  %v63_v17 = vsel %vm61_vm2, %v62_v14, %v60_v12 }
  0xd6   :  { %v68_v13 = vmul.f32 %v98_v11, %v66_v8 }
  0xd8   :  { %v70_v16 = vsel %vm69_vm1, %v66_v8, %v68_v13 }
  0xd9   :  { %v73_v18 = vsel %vm71_vm3, %v72_v15, %v70_v16 }
  0xda   :  { %v74_v19 = vsub.f32 %v63_v17, %v73_v18 }
  0xdc   :  { %v75_v20 = vadd.f32 1.0, %v74_v19 }
  0xde   :  { %v76_v21 = vmax.f32 %v75_v20, 0.0 }
  0xe0   :  { %85 = vst.msk [vmem:[%s234_s3] sm:$0xff] %vm84_vm4, %v76_v21 }
  0xe1   :  { %90 = vsyncpa [#allocation3], 1 }
  0xe2   :  { %91 = vsyncpa [#allocation5], 1 }

</bundles_post_ra>
